<compile_context>
chip_gen: v7x
topology: tpu7x:2x2x1
jax: 0.10.0
libtpu: 0.0.40
codegen_flags: <defaults>
</compile_context>

<pallas_src>
import functools

import jax
import jax.numpy as jnp
from jax import lax
from jax.experimental import pallas as pl
from jax.experimental.pallas import tpu as pltpu


def _round_up(x, m):
    return (x + m - 1) // m * m


# ----------------------------------------------------------------------------
# Fused 3-layer kernel. Per grid-step blocks (L = images_per_block * H*W):
#   x_ref : (CP, L)      input pixels, channels zero-padded to CP, batch on lanes
#   wK_ref: (CP, 9*CP)   im2col weight matrix of layer K (rows = out channels)
#   bK_ref: (CP, 1)      bias of layer K (zero in padded rows)
#   o_ref : (CP, L)      output; first C_out rows are the real result
# ----------------------------------------------------------------------------
def _inpainter_kernel(x_ref, w1_ref, b1_ref, w2_ref, b2_ref, w3_ref, b3_ref,
                      o_ref, *, H, W):
    CP, L = x_ref.shape
    HW = H * W

    # Elementary boundary masks from the PER-IMAGE flat index (flat mod HW),
    # computed once and reused by all taps of all 3 layers.  Power-of-two
    # sizes use bitwise-and instead of vector integer division.
    f = lax.broadcasted_iota(jnp.int32, (CP, L), 1)
    if HW & (HW - 1) == 0:
        fi = jnp.bitwise_and(f, HW - 1)          # flat index within its image
    else:
        fi = f % HW
    if W & (W - 1) == 0:
        w_idx = jnp.bitwise_and(f, W - 1)        # == fi mod W (HW % W == 0)
    else:
        w_idx = fi % W
    h_ge1 = fi >= W                              # h >= 1
    h_ltm = fi < (H - 1) * W                     # h <= H-2
    w_ge1 = w_idx >= 1                           # w >= 1
    w_ltm = w_idx < (W - 1)                      # w <= W-2

    def im2col(x):
        # 9 shifted copies of x (zeroed outside each image), stacked on the
        # sublane axis -> (9*CP, L). Shifts are pure lane rotations; corner
        # taps use two chained selects of the elementary masks.
        taps = []
        for dy in (-1, 0, 1):
            for dx in (-1, 0, 1):
                d = dy * W + dx                  # tap value = x[:, g + d]
                s = x if d == 0 else pltpu.roll(x, shift=(-d) % L, axis=1)
                if dy == -1:
                    s = jnp.where(h_ge1, s, 0.0)
                elif dy == 1:
                    s = jnp.where(h_ltm, s, 0.0)
                if dx == -1:
                    s = jnp.where(w_ge1, s, 0.0)
                elif dx == 1:
                    s = jnp.where(w_ltm, s, 0.0)
                taps.append(s)
        return jnp.concatenate(taps, axis=0)

    def conv(x, w_ref, b_ref, act):
        p = im2col(x)                            # (9*CP, L)
        y = jnp.dot(w_ref[...], p, preferred_element_type=jnp.float32)
        y = y + b_ref[...]                       # (CP, 1) lane-broadcast
        if act == "relu":
            return jnp.maximum(y, 0.0)
        return jax.nn.sigmoid(y)                 # EUP

    x0 = x_ref[...].astype(jnp.float32)
    x1 = conv(x0, w1_ref, b1_ref, "relu")        # ConvWithActivation 1
    x2 = conv(x1, w2_ref, b2_ref, "relu")        # ConvWithActivation 2
    x3 = conv(x2, w3_ref, b3_ref, "sigmoid")     # Conv2d + Sigmoid
    o_ref[...] = x3.astype(o_ref.dtype)


# ----------------------------------------------------------------------------
# Wrapper: weight packing + single pallas_call over 1 or 2 lane-folded blocks.
# ----------------------------------------------------------------------------
def _pack_layer(w_hwio, b, cp):
    """HWIO conv weight -> (cp, 9*cp) im2col matrix; bias -> (cp, 1).

    Rows/columns beyond the real channel counts are zero, so padded channels
    stay exactly zero through the ReLU layers.
    """
    kh, kw, ci, co = w_hwio.shape
    wp = jnp.zeros((kh, kw, cp, cp), jnp.float32)
    wp = wp.at[:, :, :ci, :co].set(w_hwio.astype(jnp.float32))
    wmat = wp.reshape(kh * kw * cp, cp).T        # [co, (ky*3+kx)*cp + ci]
    bp = jnp.zeros((cp, 1), jnp.float32).at[:co, 0].set(b.astype(jnp.float32))
    return wmat, bp


def _num_grid_blocks(N, HW):
    """1 block on single-TC parts (v5e/v6e); 2 parallel blocks on v7x (2 TCs)."""
    try:
        kind = jax.devices()[0].device_kind.lower()
    except Exception:
        kind = ""
    if "v7" in kind and N % 2 == 0 and ((N // 2) * HW) % 128 == 0:
        return 2
    return 1


@jax.jit
def inpainter_forward(x_nchw, params):
    N, cin, H, W = x_nchw.shape
    c1 = params["w1"].shape[-1]
    c2 = params["w2"].shape[-1]
    cout = params["w3"].shape[-1]
    cp = _round_up(max(cin, c1, c2, cout, 1), 8)
    hw = H * W

    nb = _num_grid_blocks(N, hw)                 # grid steps (1 or 2)
    lanes = (N // nb) * hw                       # lane width per block

    # Fold the batch into the lane axis: (N, C, HW) -> (C, N*HW).  The tiny
    # transpose runs once in XLA outside the kernel; inside, everything is a
    # lane-dense (cp, N*HW) slab.  Pad channels to cp (zeros).
    x = x_nchw.reshape(N, cin, hw).transpose(1, 0, 2).reshape(cin, N * hw)
    if cin != cp:
        x = jnp.pad(x, ((0, cp - cin), (0, 0)))

    w1, b1 = _pack_layer(params["w1"], params["b1"], cp)
    w2, b2 = _pack_layer(params["w2"], params["b2"], cp)
    w3, b3 = _pack_layer(params["w3"], params["b3"], cp)

    kernel = functools.partial(_inpainter_kernel, H=H, W=W)
    out = pl.pallas_call(
        kernel,
        grid=(nb,),
        in_specs=[
            pl.BlockSpec((cp, lanes), lambda i: (0, i)),      # x (lane-folded)
            pl.BlockSpec((cp, 9 * cp), lambda i: (0, 0)),     # w1
            pl.BlockSpec((cp, 1), lambda i: (0, 0)),          # b1
            pl.BlockSpec((cp, 9 * cp), lambda i: (0, 0)),     # w2
            pl.BlockSpec((cp, 1), lambda i: (0, 0)),          # b2
            pl.BlockSpec((cp, 9 * cp), lambda i: (0, 0)),     # w3
            pl.BlockSpec((cp, 1), lambda i: (0, 0)),          # b3
        ],
        out_specs=pl.BlockSpec((cp, lanes), lambda i: (0, i)),
        out_shape=jax.ShapeDtypeStruct((cp, N * hw), x_nchw.dtype),
        compiler_params=pltpu.CompilerParams(
            dimension_semantics=("parallel",)),
    )(x, w1, b1, w2, b2, w3, b3)

    # (cp, N*HW) -> (N, cout, H, W); drop padded channel rows first.
    return out[:cout].reshape(cout, N, H, W).transpose(1, 0, 2, 3)


# ----------------------------------------------------------------------------
# Parameter init (synthetic, deterministic) and pure-JAX reference.
# ----------------------------------------------------------------------------
def init_params(key, in_channels, out_channels):
    c1 = in_channels // 2
    c2 = in_channels // 4
    ks = jax.random.split(key, 6)

    def w_init(k, cin, cout):
        scale = 1.0 / jnp.sqrt(9.0 * cin)
        return jax.random.normal(k, (3, 3, cin, cout), jnp.float32) * scale

    def b_init(k, cout):
        return jax.random.normal(k, (cout,), jnp.float32) * 0.01

    return {
        "w1": w_init(ks[0], in_channels, c1), "b1": b_init(ks[1], c1),
        "w2": w_init(ks[2], c1, c2),          "b2": b_init(ks[3], c2),
        "w3": w_init(ks[4], c2, out_channels), "b3": b_init(ks[5], out_channels),
    }


def _ref_conv_nchw(x, w_hwio, b, activation):
    y = lax.conv_general_dilated(
        x, w_hwio, window_strides=(1, 1), padding="SAME",
        dimension_numbers=("NCHW", "HWIO", "NCHW"),
    ) + b.reshape(1, -1, 1, 1)
    if activation == "relu":
        return jnp.maximum(y, 0.0)
    if activation == "sigmoid":
        return jax.nn.sigmoid(y)
    return y


def inpainter_reference(x_nchw, params):
    x = _ref_conv_nchw(x_nchw, params["w1"], params["b1"], "relu")
    x = _ref_conv_nchw(x, params["w2"], params["b2"], "relu")
    x = _ref_conv_nchw(x, params["w3"], params["b3"], "sigmoid")
    return x


if __name__ == "__main__":
    key = jax.random.PRNGKey(0)
    k_x, k_p = jax.random.split(key)

    N, C_IN, C_OUT, H, W = 2, 8, 3, 16, 16   # x is NCHW [2, 8, 16, 16]
    x = jax.random.normal(k_x, (N, C_IN, H, W), jnp.float32)
    params = init_params(k_p, C_IN, C_OUT)

    out = jax.block_until_ready(inpainter_forward(x, params))
    ref = inpainter_reference(x, params)

    assert out.shape == (N, C_OUT, H, W), out.shape
    assert jnp.allclose(out, ref, atol=1e-5, rtol=1e-5), (
        float(jnp.max(jnp.abs(out - ref)))
    )
    print("KERNEL_OK")
</pallas_src>

<mosaic_0001>
module attributes {stable_mosaic.version = 11 : i64} {
  func.func @_inpainter_kernel(%arg0: i32, %arg1: memref<8x512xf32, #tpu.memory_space<vmem>>, %arg2: memref<8x72xf32, #tpu.memory_space<vmem>>, %arg3: memref<8x1xf32, #tpu.memory_space<vmem>>, %arg4: memref<8x72xf32, #tpu.memory_space<vmem>>, %arg5: memref<8x1xf32, #tpu.memory_space<vmem>>, %arg6: memref<8x72xf32, #tpu.memory_space<vmem>>, %arg7: memref<8x1xf32, #tpu.memory_space<vmem>>, %arg8: memref<8x512xf32, #tpu.memory_space<vmem>>) attributes {dimension_semantics = [#tpu.dimension_semantics<parallel>], iteration_bounds = array<i64: 1>, scalar_prefetch = 0 : i64, scratch_operands = 0 : i64, tpu.core_type = #tpu.core_type<tc>, window_params = [{transform_indices = @transform_0, window_bounds = array<i64: 8, 512>}, {pipeline_mode = #tpu.pipeline_mode<synchronous>, transform_indices = @transform_1, window_bounds = array<i64: 8, 72>}, {pipeline_mode = #tpu.pipeline_mode<synchronous>, transform_indices = @transform_2, window_bounds = array<i64: 8, 1>}, {pipeline_mode = #tpu.pipeline_mode<synchronous>, transform_indices = @transform_3, window_bounds = array<i64: 8, 72>}, {pipeline_mode = #tpu.pipeline_mode<synchronous>, transform_indices = @transform_4, window_bounds = array<i64: 8, 1>}, {pipeline_mode = #tpu.pipeline_mode<synchronous>, transform_indices = @transform_5, window_bounds = array<i64: 8, 72>}, {pipeline_mode = #tpu.pipeline_mode<synchronous>, transform_indices = @transform_6, window_bounds = array<i64: 8, 1>}, {transform_indices = @transform_7, window_bounds = array<i64: 8, 512>}]} {
    %0 = tpu.iota {dimensions = array<i32: 1>} : vector<8x512xi32>
    %c255_i32 = arith.constant 255 : i32
    %1 = vector.broadcast %c255_i32 : i32 to vector<8x512xi32>
    %2 = arith.andi %0, %1 : vector<8x512xi32>
    %c15_i32 = arith.constant 15 : i32
    %3 = vector.broadcast %c15_i32 : i32 to vector<8x512xi32>
    %4 = arith.andi %0, %3 : vector<8x512xi32>
    %c16_i32 = arith.constant 16 : i32
    %5 = vector.broadcast %c16_i32 : i32 to vector<8x512xi32>
    %6 = arith.cmpi sge, %2, %5 : vector<8x512xi32>
    %c240_i32 = arith.constant 240 : i32
    %7 = vector.broadcast %c240_i32 : i32 to vector<8x512xi32>
    %8 = arith.cmpi slt, %2, %7 : vector<8x512xi32>
    %c1_i32 = arith.constant 1 : i32
    %9 = vector.broadcast %c1_i32 : i32 to vector<8x512xi32>
    %10 = arith.cmpi sge, %4, %9 : vector<8x512xi32>
    %c15_i32_0 = arith.constant 15 : i32
    %11 = vector.broadcast %c15_i32_0 : i32 to vector<8x512xi32>
    %12 = arith.cmpi slt, %4, %11 : vector<8x512xi32>
    %c0 = arith.constant 0 : index
    %c0_1 = arith.constant 0 : index
    %13 = vector.load %arg1[%c0, %c0_1] : memref<8x512xf32, #tpu.memory_space<vmem>>, vector<8x512xf32>
    %c17_i32 = arith.constant 17 : i32
    %14 = tpu.dynamic_rotate %13 by %c17_i32 dim 1 : vector<8x512xf32>, i32 -> vector<8x512xf32>
    %cst = arith.constant 0.000000e+00 : f32
    %15 = vector.broadcast %cst : f32 to vector<8x512xf32>
    %16 = arith.select %6, %14, %15 : vector<8x512xi1>, vector<8x512xf32>
    %cst_2 = arith.constant 0.000000e+00 : f32
    %17 = vector.broadcast %cst_2 : f32 to vector<8x512xf32>
    %18 = arith.select %10, %16, %17 : vector<8x512xi1>, vector<8x512xf32>
    %c16_i32_3 = arith.constant 16 : i32
    %19 = tpu.dynamic_rotate %13 by %c16_i32_3 dim 1 : vector<8x512xf32>, i32 -> vector<8x512xf32>
    %cst_4 = arith.constant 0.000000e+00 : f32
    %20 = vector.broadcast %cst_4 : f32 to vector<8x512xf32>
    %21 = arith.select %6, %19, %20 : vector<8x512xi1>, vector<8x512xf32>
    %c15_i32_5 = arith.constant 15 : i32
    %22 = tpu.dynamic_rotate %13 by %c15_i32_5 dim 1 : vector<8x512xf32>, i32 -> vector<8x512xf32>
    %cst_6 = arith.constant 0.000000e+00 : f32
    %23 = vector.broadcast %cst_6 : f32 to vector<8x512xf32>
    %24 = arith.select %6, %22, %23 : vector<8x512xi1>, vector<8x512xf32>
    %cst_7 = arith.constant 0.000000e+00 : f32
    %25 = vector.broadcast %cst_7 : f32 to vector<8x512xf32>
    %26 = arith.select %12, %24, %25 : vector<8x512xi1>, vector<8x512xf32>
    %c1_i32_8 = arith.constant 1 : i32
    %27 = tpu.dynamic_rotate %13 by %c1_i32_8 dim 1 : vector<8x512xf32>, i32 -> vector<8x512xf32>
    %cst_9 = arith.constant 0.000000e+00 : f32
    %28 = vector.broadcast %cst_9 : f32 to vector<8x512xf32>
    %29 = arith.select %10, %27, %28 : vector<8x512xi1>, vector<8x512xf32>
    %c511_i32 = arith.constant 511 : i32
    %30 = tpu.dynamic_rotate %13 by %c511_i32 dim 1 : vector<8x512xf32>, i32 -> vector<8x512xf32>
    %cst_10 = arith.constant 0.000000e+00 : f32
    %31 = vector.broadcast %cst_10 : f32 to vector<8x512xf32>
    %32 = arith.select %12, %30, %31 : vector<8x512xi1>, vector<8x512xf32>
    %c497_i32 = arith.constant 497 : i32
    %33 = tpu.dynamic_rotate %13 by %c497_i32 dim 1 : vector<8x512xf32>, i32 -> vector<8x512xf32>
    %cst_11 = arith.constant 0.000000e+00 : f32
    %34 = vector.broadcast %cst_11 : f32 to vector<8x512xf32>
    %35 = arith.select %8, %33, %34 : vector<8x512xi1>, vector<8x512xf32>
    %cst_12 = arith.constant 0.000000e+00 : f32
    %36 = vector.broadcast %cst_12 : f32 to vector<8x512xf32>
    %37 = arith.select %10, %35, %36 : vector<8x512xi1>, vector<8x512xf32>
    %c496_i32 = arith.constant 496 : i32
    %38 = tpu.dynamic_rotate %13 by %c496_i32 dim 1 : vector<8x512xf32>, i32 -> vector<8x512xf32>
    %cst_13 = arith.constant 0.000000e+00 : f32
    %39 = vector.broadcast %cst_13 : f32 to vector<8x512xf32>
    %40 = arith.select %8, %38, %39 : vector<8x512xi1>, vector<8x512xf32>
    %c495_i32 = arith.constant 495 : i32
    %41 = tpu.dynamic_rotate %13 by %c495_i32 dim 1 : vector<8x512xf32>, i32 -> vector<8x512xf32>
    %cst_14 = arith.constant 0.000000e+00 : f32
    %42 = vector.broadcast %cst_14 : f32 to vector<8x512xf32>
    %43 = arith.select %8, %41, %42 : vector<8x512xi1>, vector<8x512xf32>
    %cst_15 = arith.constant 0.000000e+00 : f32
    %44 = vector.broadcast %cst_15 : f32 to vector<8x512xf32>
    %45 = arith.select %12, %43, %44 : vector<8x512xi1>, vector<8x512xf32>
    %46 = tpu.concatenate %18, %21, %26, %29, %13, %32, %37, %40, %45 in 0 : vector<8x512xf32>, vector<8x512xf32>, vector<8x512xf32>, vector<8x512xf32>, vector<8x512xf32>, vector<8x512xf32>, vector<8x512xf32>, vector<8x512xf32>, vector<8x512xf32> -> vector<72x512xf32>
    %c0_16 = arith.constant 0 : index
    %c0_17 = arith.constant 0 : index
    %47 = vector.load %arg2[%c0_16, %c0_17] : memref<8x72xf32, #tpu.memory_space<vmem>>, vector<8x72xf32>
    %cst_18 = arith.constant dense<0.000000e+00> : vector<8x512xf32>
    %48 = tpu.matmul %47, %46, %cst_18 {dimension_numbers = #tpu.dot_dimension_numbers<[1], [0], [0], [1], [0, 0, 1, 1], [], []>} : vector<8x72xf32>, vector<72x512xf32>, vector<8x512xf32> -> vector<8x512xf32>
    %c0_19 = arith.constant 0 : index
    %c0_20 = arith.constant 0 : index
    %49 = vector.load %arg3[%c0_19, %c0_20] : memref<8x1xf32, #tpu.memory_space<vmem>>, vector<8x1xf32>
    %50 = vector.broadcast %49 : vector<8x1xf32> to vector<8x512xf32>
    %51 = arith.addf %48, %50 : vector<8x512xf32>
    %cst_21 = arith.constant 0.000000e+00 : f32
    %52 = vector.broadcast %cst_21 : f32 to vector<8x512xf32>
    %53 = arith.maximumf %51, %52 : vector<8x512xf32>
    %c17_i32_22 = arith.constant 17 : i32
    %54 = tpu.dynamic_rotate %53 by %c17_i32_22 dim 1 : vector<8x512xf32>, i32 -> vector<8x512xf32>
    %cst_23 = arith.constant 0.000000e+00 : f32
    %55 = vector.broadcast %cst_23 : f32 to vector<8x512xf32>
    %56 = arith.select %6, %54, %55 : vector<8x512xi1>, vector<8x512xf32>
    %cst_24 = arith.constant 0.000000e+00 : f32
    %57 = vector.broadcast %cst_24 : f32 to vector<8x512xf32>
    %58 = arith.select %10, %56, %57 : vector<8x512xi1>, vector<8x512xf32>
    %c16_i32_25 = arith.constant 16 : i32
    %59 = tpu.dynamic_rotate %53 by %c16_i32_25 dim 1 : vector<8x512xf32>, i32 -> vector<8x512xf32>
    %cst_26 = arith.constant 0.000000e+00 : f32
    %60 = vector.broadcast %cst_26 : f32 to vector<8x512xf32>
    %61 = arith.select %6, %59, %60 : vector<8x512xi1>, vector<8x512xf32>
    %c15_i32_27 = arith.constant 15 : i32
    %62 = tpu.dynamic_rotate %53 by %c15_i32_27 dim 1 : vector<8x512xf32>, i32 -> vector<8x512xf32>
    %cst_28 = arith.constant 0.000000e+00 : f32
    %63 = vector.broadcast %cst_28 : f32 to vector<8x512xf32>
    %64 = arith.select %6, %62, %63 : vector<8x512xi1>, vector<8x512xf32>
    %cst_29 = arith.constant 0.000000e+00 : f32
    %65 = vector.broadcast %cst_29 : f32 to vector<8x512xf32>
    %66 = arith.select %12, %64, %65 : vector<8x512xi1>, vector<8x512xf32>
    %c1_i32_30 = arith.constant 1 : i32
    %67 = tpu.dynamic_rotate %53 by %c1_i32_30 dim 1 : vector<8x512xf32>, i32 -> vector<8x512xf32>
    %cst_31 = arith.constant 0.000000e+00 : f32
    %68 = vector.broadcast %cst_31 : f32 to vector<8x512xf32>
    %69 = arith.select %10, %67, %68 : vector<8x512xi1>, vector<8x512xf32>
    %c511_i32_32 = arith.constant 511 : i32
    %70 = tpu.dynamic_rotate %53 by %c511_i32_32 dim 1 : vector<8x512xf32>, i32 -> vector<8x512xf32>
    %cst_33 = arith.constant 0.000000e+00 : f32
    %71 = vector.broadcast %cst_33 : f32 to vector<8x512xf32>
    %72 = arith.select %12, %70, %71 : vector<8x512xi1>, vector<8x512xf32>
    %c497_i32_34 = arith.constant 497 : i32
    %73 = tpu.dynamic_rotate %53 by %c497_i32_34 dim 1 : vector<8x512xf32>, i32 -> vector<8x512xf32>
    %cst_35 = arith.constant 0.000000e+00 : f32
    %74 = vector.broadcast %cst_35 : f32 to vector<8x512xf32>
    %75 = arith.select %8, %73, %74 : vector<8x512xi1>, vector<8x512xf32>
    %cst_36 = arith.constant 0.000000e+00 : f32
    %76 = vector.broadcast %cst_36 : f32 to vector<8x512xf32>
    %77 = arith.select %10, %75, %76 : vector<8x512xi1>, vector<8x512xf32>
    %c496_i32_37 = arith.constant 496 : i32
    %78 = tpu.dynamic_rotate %53 by %c496_i32_37 dim 1 : vector<8x512xf32>, i32 -> vector<8x512xf32>
    %cst_38 = arith.constant 0.000000e+00 : f32
    %79 = vector.broadcast %cst_38 : f32 to vector<8x512xf32>
    %80 = arith.select %8, %78, %79 : vector<8x512xi1>, vector<8x512xf32>
    %c495_i32_39 = arith.constant 495 : i32
    %81 = tpu.dynamic_rotate %53 by %c495_i32_39 dim 1 : vector<8x512xf32>, i32 -> vector<8x512xf32>
    %cst_40 = arith.constant 0.000000e+00 : f32
    %82 = vector.broadcast %cst_40 : f32 to vector<8x512xf32>
    %83 = arith.select %8, %81, %82 : vector<8x512xi1>, vector<8x512xf32>
    %cst_41 = arith.constant 0.000000e+00 : f32
    %84 = vector.broadcast %cst_41 : f32 to vector<8x512xf32>
    %85 = arith.select %12, %83, %84 : vector<8x512xi1>, vector<8x512xf32>
    %86 = tpu.concatenate %58, %61, %66, %69, %53, %72, %77, %80, %85 in 0 : vector<8x512xf32>, vector<8x512xf32>, vector<8x512xf32>, vector<8x512xf32>, vector<8x512xf32>, vector<8x512xf32>, vector<8x512xf32>, vector<8x512xf32>, vector<8x512xf32> -> vector<72x512xf32>
    %c0_42 = arith.constant 0 : index
    %c0_43 = arith.constant 0 : index
    %87 = vector.load %arg4[%c0_42, %c0_43] : memref<8x72xf32, #tpu.memory_space<vmem>>, vector<8x72xf32>
    %cst_44 = arith.constant dense<0.000000e+00> : vector<8x512xf32>
    %88 = tpu.matmul %87, %86, %cst_44 {dimension_numbers = #tpu.dot_dimension_numbers<[1], [0], [0], [1], [0, 0, 1, 1], [], []>} : vector<8x72xf32>, vector<72x512xf32>, vector<8x512xf32> -> vector<8x512xf32>
    %c0_45 = arith.constant 0 : index
    %c0_46 = arith.constant 0 : index
    %89 = vector.load %arg5[%c0_45, %c0_46] : memref<8x1xf32, #tpu.memory_space<vmem>>, vector<8x1xf32>
    %90 = vector.broadcast %89 : vector<8x1xf32> to vector<8x512xf32>
    %91 = arith.addf %88, %90 : vector<8x512xf32>
    %cst_47 = arith.constant 0.000000e+00 : f32
    %92 = vector.broadcast %cst_47 : f32 to vector<8x512xf32>
    %93 = arith.maximumf %91, %92 : vector<8x512xf32>
    %c17_i32_48 = arith.constant 17 : i32
    %94 = tpu.dynamic_rotate %93 by %c17_i32_48 dim 1 : vector<8x512xf32>, i32 -> vector<8x512xf32>
    %cst_49 = arith.constant 0.000000e+00 : f32
    %95 = vector.broadcast %cst_49 : f32 to vector<8x512xf32>
    %96 = arith.select %6, %94, %95 : vector<8x512xi1>, vector<8x512xf32>
    %cst_50 = arith.constant 0.000000e+00 : f32
    %97 = vector.broadcast %cst_50 : f32 to vector<8x512xf32>
    %98 = arith.select %10, %96, %97 : vector<8x512xi1>, vector<8x512xf32>
    %c16_i32_51 = arith.constant 16 : i32
    %99 = tpu.dynamic_rotate %93 by %c16_i32_51 dim 1 : vector<8x512xf32>, i32 -> vector<8x512xf32>
    %cst_52 = arith.constant 0.000000e+00 : f32
    %100 = vector.broadcast %cst_52 : f32 to vector<8x512xf32>
    %101 = arith.select %6, %99, %100 : vector<8x512xi1>, vector<8x512xf32>
    %c15_i32_53 = arith.constant 15 : i32
    %102 = tpu.dynamic_rotate %93 by %c15_i32_53 dim 1 : vector<8x512xf32>, i32 -> vector<8x512xf32>
    %cst_54 = arith.constant 0.000000e+00 : f32
    %103 = vector.broadcast %cst_54 : f32 to vector<8x512xf32>
    %104 = arith.select %6, %102, %103 : vector<8x512xi1>, vector<8x512xf32>
    %cst_55 = arith.constant 0.000000e+00 : f32
    %105 = vector.broadcast %cst_55 : f32 to vector<8x512xf32>
    %106 = arith.select %12, %104, %105 : vector<8x512xi1>, vector<8x512xf32>
    %c1_i32_56 = arith.constant 1 : i32
    %107 = tpu.dynamic_rotate %93 by %c1_i32_56 dim 1 : vector<8x512xf32>, i32 -> vector<8x512xf32>
    %cst_57 = arith.constant 0.000000e+00 : f32
    %108 = vector.broadcast %cst_57 : f32 to vector<8x512xf32>
    %109 = arith.select %10, %107, %108 : vector<8x512xi1>, vector<8x512xf32>
    %c511_i32_58 = arith.constant 511 : i32
    %110 = tpu.dynamic_rotate %93 by %c511_i32_58 dim 1 : vector<8x512xf32>, i32 -> vector<8x512xf32>
    %cst_59 = arith.constant 0.000000e+00 : f32
    %111 = vector.broadcast %cst_59 : f32 to vector<8x512xf32>
    %112 = arith.select %12, %110, %111 : vector<8x512xi1>, vector<8x512xf32>
    %c497_i32_60 = arith.constant 497 : i32
    %113 = tpu.dynamic_rotate %93 by %c497_i32_60 dim 1 : vector<8x512xf32>, i32 -> vector<8x512xf32>
    %cst_61 = arith.constant 0.000000e+00 : f32
    %114 = vector.broadcast %cst_61 : f32 to vector<8x512xf32>
    %115 = arith.select %8, %113, %114 : vector<8x512xi1>, vector<8x512xf32>
    %cst_62 = arith.constant 0.000000e+00 : f32
    %116 = vector.broadcast %cst_62 : f32 to vector<8x512xf32>
    %117 = arith.select %10, %115, %116 : vector<8x512xi1>, vector<8x512xf32>
    %c496_i32_63 = arith.constant 496 : i32
    %118 = tpu.dynamic_rotate %93 by %c496_i32_63 dim 1 : vector<8x512xf32>, i32 -> vector<8x512xf32>
    %cst_64 = arith.constant 0.000000e+00 : f32
    %119 = vector.broadcast %cst_64 : f32 to vector<8x512xf32>
    %120 = arith.select %8, %118, %119 : vector<8x512xi1>, vector<8x512xf32>
    %c495_i32_65 = arith.constant 495 : i32
    %121 = tpu.dynamic_rotate %93 by %c495_i32_65 dim 1 : vector<8x512xf32>, i32 -> vector<8x512xf32>
    %cst_66 = arith.constant 0.000000e+00 : f32
    %122 = vector.broadcast %cst_66 : f32 to vector<8x512xf32>
    %123 = arith.select %8, %121, %122 : vector<8x512xi1>, vector<8x512xf32>
    %cst_67 = arith.constant 0.000000e+00 : f32
    %124 = vector.broadcast %cst_67 : f32 to vector<8x512xf32>
    %125 = arith.select %12, %123, %124 : vector<8x512xi1>, vector<8x512xf32>
    %126 = tpu.concatenate %98, %101, %106, %109, %93, %112, %117, %120, %125 in 0 : vector<8x512xf32>, vector<8x512xf32>, vector<8x512xf32>, vector<8x512xf32>, vector<8x512xf32>, vector<8x512xf32>, vector<8x512xf32>, vector<8x512xf32>, vector<8x512xf32> -> vector<72x512xf32>
    %c0_68 = arith.constant 0 : index
    %c0_69 = arith.constant 0 : index
    %127 = vector.load %arg6[%c0_68, %c0_69] : memref<8x72xf32, #tpu.memory_space<vmem>>, vector<8x72xf32>
    %cst_70 = arith.constant dense<0.000000e+00> : vector<8x512xf32>
    %128 = tpu.matmul %127, %126, %cst_70 {dimension_numbers = #tpu.dot_dimension_numbers<[1], [0], [0], [1], [0, 0, 1, 1], [], []>} : vector<8x72xf32>, vector<72x512xf32>, vector<8x512xf32> -> vector<8x512xf32>
    %c0_71 = arith.constant 0 : index
    %c0_72 = arith.constant 0 : index
    %129 = vector.load %arg7[%c0_71, %c0_72] : memref<8x1xf32, #tpu.memory_space<vmem>>, vector<8x1xf32>
    %130 = vector.broadcast %129 : vector<8x1xf32> to vector<8x512xf32>
    %131 = arith.addf %128, %130 : vector<8x512xf32>
    %132 = arith.negf %131 : vector<8x512xf32>
    %133 = math.exp %132 : vector<8x512xf32>
    %cst_73 = arith.constant 1.000000e+00 : f32
    %134 = vector.broadcast %cst_73 : f32 to vector<8x512xf32>
    %135 = arith.addf %134, %133 : vector<8x512xf32>
    %136 = arith.divf %134, %135 : vector<8x512xf32>
    %c0_74 = arith.constant 0 : index
    %c0_75 = arith.constant 0 : index
    %137 = vector.load %arg8[%c0_74, %c0_75] : memref<8x512xf32, #tpu.memory_space<vmem>>, vector<8x512xf32>
    tpu.vector_store %arg8[%c0_74, %c0_75], %136 {strides = array<i32>} : memref<8x512xf32, #tpu.memory_space<vmem>>, vector<8x512xf32>,
    return
  }
  func.func @transform_0(%arg0: i32) -> (i32, i32) {
    %c0_i32 = arith.constant 0 : i32
    %c0_i32_0 = arith.constant 0 : i32
    return %c0_i32, %arg0 : i32, i32
  }
  func.func @transform_1(%arg0: i32) -> (i32, i32) {
    %c0_i32 = arith.constant 0 : i32
    %c0_i32_0 = arith.constant 0 : i32
    %c0_i32_1 = arith.constant 0 : i32
    return %c0_i32, %c0_i32_0 : i32, i32
  }
  func.func @transform_2(%arg0: i32) -> (i32, i32) {
    %c0_i32 = arith.constant 0 : i32
    %c0_i32_0 = arith.constant 0 : i32
    %c0_i32_1 = arith.constant 0 : i32
    return %c0_i32, %c0_i32_0 : i32, i32
  }
  func.func @transform_3(%arg0: i32) -> (i32, i32) {
    %c0_i32 = arith.constant 0 : i32
    %c0_i32_0 = arith.constant 0 : i32
    %c0_i32_1 = arith.constant 0 : i32
    return %c0_i32, %c0_i32_0 : i32, i32
  }
  func.func @transform_4(%arg0: i32) -> (i32, i32) {
    %c0_i32 = arith.constant 0 : i32
    %c0_i32_0 = arith.constant 0 : i32
    %c0_i32_1 = arith.constant 0 : i32
    return %c0_i32, %c0_i32_0 : i32, i32
  }
  func.func @transform_5(%arg0: i32) -> (i32, i32) {
    %c0_i32 = arith.constant 0 : i32
    %c0_i32_0 = arith.constant 0 : i32
    %c0_i32_1 = arith.constant 0 : i32
    return %c0_i32, %c0_i32_0 : i32, i32
  }
  func.func @transform_6(%arg0: i32) -> (i32, i32) {
    %c0_i32 = arith.constant 0 : i32
    %c0_i32_0 = arith.constant 0 : i32
    %c0_i32_1 = arith.constant 0 : i32
    return %c0_i32, %c0_i32_0 : i32, i32
  }
  func.func @transform_7(%arg0: i32) -> (i32, i32) {
    %c0_i32 = arith.constant 0 : i32
    %c0_i32_0 = arith.constant 0 : i32
    return %c0_i32, %arg0 : i32, i32
  }
}

</mosaic_0001>

<bundles_post_ra>
// kernel: inpainter_forward.1
= control target key start
LH: loop header
LB: loop body
LE: loop exit
PB: predicated region body
PF: predicated region fallthrough
CT: control target
= control target key end

     0   :  { %s1473_s9 = smov 16   ;;  %s1474_s10 = smov 17   ;;  %v1479_v6 = vmov 0.0   ;;  %v1481_v7 = vmov 0   ;;  %v26_v9 = vlaneseq  ;;  %vm2253_vm3 = vmmov 1   ;;  %s2243_s0 = inlined_call_operand.vmem [shape: f32[8,512], index: 0, kind: input, shape index: {}]   ;;  %s2244_s2 = inlined_call_operand.vmem [shape: f32[8,1], index: 2, kind: input, shape index: {}]   ;;  %s2245_s1 = inlined_call_operand.vmem [shape: f32[8,72], index: 1, kind: input, shape index: {}]   ;;  %s2246_s4 = inlined_call_operand.vmem [shape: f32[8,1], index: 4, kind: input, shape index: {}]   ;;  %s2247_s3 = inlined_call_operand.vmem [shape: f32[8,72], index: 3, kind: input, shape index: {}]   ;;  %s2248_s6 = inlined_call_operand.vmem [shape: f32[8,1], index: 6, kind: input, shape index: {}]   ;;  %s2249_s5 = inlined_call_operand.vmem [shape: f32[8,72], index: 5, kind: input, shape index: {}]   ;;  %s2250_s7 = inlined_call_operand.vmem [shape: f32[8,512], index: 7, kind: output, shape index: {}]  }
   0x1   :  { %v1527_v0 = vld [vmem:[%s2243_s0] sm:$0xff]  ;;  %v1532_v1 = vld [vmem:[%s2243_s0 + $0x8] sm:$0xff]  ;;  %v1537_v2 = vld [vmem:[%s2243_s0 + $0x10] sm:$0xff]  ;;  %s1475_s11 = smov 15   ;;  %s1477_s12 = smov 127   ;;  %286 = vmatprep.mubr.f32.mxu0 %v1479_v6  ;;  %357 = vmatprep.mubr.f32.mxu1 %v1479_v6  ;;  %v2296_v29 = vmov 0 }
   0x2   :  { %v1255_v3 = vpack.i.bf16 %v1532_v1, %v1527_v0  ;;  %v1544_v4 = vld [vmem:[%s2243_s0 + $0x18] sm:$0xff]  ;;  %s1476_s0 = smov 1   ;;  %s1478_s13 = smov 113   ;;  %1315 = vset.pattern.permute.xlu0 %v1481_v7  ;;  %1456 = vset.pattern.permute.xlu1 %v1481_v7  ;;  %v212_v8 = vld [vmem:[%s2244_s2] sm:$0xff]  ;;  %v1575_v10 = vand.u32 127, %v26_v9  ;;  %v2298_v33 = vmov 0 }
   0x3   :  { %v1260_v5 = vpack.i.bf16 %v1544_v4, %v1537_v2  ;;  %s1480_s14 = smov 112   ;;  %s1482_s15 = smov 111   ;;  %v2302_v39 = vmov 0  ;;  %v2306_v41 = vmov 0  ;;  %v2308_v44 = vmov 0  ;;  %v812_v17 = vld [vmem:[%s2249_s5] sm:$0xff] }
   0x4   :  { %1256 = vrot.lane.b32.xlu1 %v1255_v3, %s1473_s9  ;;  %1246 = vrot.lane.b32.xlu0 %v1255_v3, %s1474_s10  ;;  %v1578_v11 = vadd.s32 128, %v1575_v10  ;;  %v1582_v13 = vadd.s32 384, %v1575_v10  ;;  %v29_v14 = vadd.s32 256, %v1575_v10  ;;  %vm2251_vm0 = vcmp.lt.s32.totalorder %v1575_v10, 17 }
   0x5   :  { %vm2252_vm2 = vcmp.lt.s32.totalorder %v1575_v10, 16  ;;  %v31_v18 = vand.u32 255, %v1575_v10  ;;  %v35_v25 = vand.u32 15, %v1575_v10  ;;  %vm2259_vm7 = vcmp.lt.s32.totalorder %v1575_v10, 15 }
   0x6   :  { %v36_v12 = vand.u32 15, %v1578_v11  ;;  %v38_v19 = vand.u32 15, %v1582_v13  ;;  %v33_v24 = vand.u32 255, %v29_v14  ;;  %v37_v26 = vand.u32 15, %v29_v14 }
   0x7   :  { %vm1605_vm5 = vcmp.ge.s32.totalorder %v31_v18, 16  ;;  %vm1620_vm9 = vcmp.ge.s32.totalorder %v35_v25, 1  ;;  %v2310_v57 = vmov 0  ;;  %v2312_v60 = vmov 0 }
   0x8   :  { %1261 = vrot.lane.b32.xlu1 %v1260_v5, %s1473_s9  ;;  %1251 = vrot.lane.b32.xlu0 %v1260_v5, %s1474_s10  ;;  %vm1586_vm1 = vcmp.ge.s32.totalorder %v36_v12, 1  ;;  %v2299_v33 = vsel %vm1605_vm5, 4294967295, %v2298_v33  ;;  %vm1609_vm6 = vcmp.ge.s32.totalorder %v38_v19, 1  ;;  %vm1616_vm8 = vcmp.ge.s32.totalorder %v33_v24, 16  ;;  %vm1653_vm12 = vmpackc.low %vm1605_vm5, %vm1620_vm9 }
   0x9   :  { %vm1601_vm4 = vmpackc.low %vm2253_vm3, %vm1586_vm1  ;;  %v2303_v39 = vsel %vm1616_vm8, 4294967295, %v2302_v39  ;;  %vm1624_vm10 = vcmp.ge.s32.totalorder %v37_v26, 1  ;;  %v2311_v57 = vsel %vm1653_vm12, 4294967295, %v2310_v57  ;;  %vm1662_vm14 = vcmp.lt.s32.totalorder %v36_v12, 15 }
   0xa   :  { %v2297_v29 = vsel %vm1601_vm4, 4294967295, %v2296_v29  ;;  %v2307_v41 = vsel %vm1624_vm10, 4294967295, %v2306_v41  ;;  %vm1635_vm11 = vmpackc.low %vm2253_vm3, %vm1609_vm6  ;;  %v2313_v60 = vsel %vm1662_vm14, 4294967295, %v2312_v60  ;;  %v2314_v63 = vmov 0 }
   0xb   :  { %v2309_v44 = vsel %vm1635_vm11, 4294967295, %v2308_v44  ;;  %vm1674_vm15 = vmpackc.low %vm1616_vm8, %vm1624_vm10  ;;  %vm1683_vm3 = vcmp.lt.s32.totalorder %v35_v25, 15  ;;  %vm1689_vm13 = vcmp.lt.s32.totalorder %v37_v26, 15  ;;  %v2320_v7 = vmov 0 }
   0xc   :  { %1271 = vrot.lane.b32.xlu1 %v1260_v5, %s1475_s11  ;;  %1266 = vrot.lane.b32.xlu0 %v1255_v3, %s1475_s11  ;;  %v2315_v63 = vsel %vm1674_vm15, 4294967295, %v2314_v63  ;;  %v2321_v7 = vsel %vm1689_vm13, 4294967295, %v2320_v7 }
  0x10   :  { %1281 = vrot.lane.b32.xlu1 %v1260_v5, %s1476_s0  ;;  %1276 = vrot.lane.b32.xlu0 %v1255_v3, %s1476_s0 }
  0x14   :  { %1291 = vrot.lane.b32.xlu1 %v1260_v5, %s1477_s12  ;;  %1286 = vrot.lane.b32.xlu0 %v1255_v3, %s1477_s12 }
  0x18   :  { %1301 = vrot.lane.b32.xlu1 %v1260_v5, %s1478_s13  ;;  %1296 = vrot.lane.b32.xlu0 %v1255_v3, %s1478_s13 }
  0x1c   :  { %1311 = vrot.lane.b32.xlu1 %v1260_v5, %s1480_s14  ;;  %1306 = vrot.lane.b32.xlu0 %v1255_v3, %s1480_s14  ;;  %v2316_v3 = vmov 0  ;;  %v2318_v5 = vmov 0 }
  0x1d   :  { %v2319_v5 = vsel %vm1683_vm3, 4294967295, %v2318_v5 }
  0x20   :  { %192 = vrot.lane.b32.xlu1 %v1532_v1, %s1482_s15  ;;  %190 = vrot.lane.b32.xlu0 %v1527_v0, %s1482_s15 }
  0x24   :  { %196 = vrot.lane.b32.xlu1 %v1544_v4, %s1482_s15  ;;  %194 = vrot.lane.b32.xlu0 %v1537_v2, %s1482_s15 }
  0x28   :  { %215 = vperm.xlu0 %1315, %v212_v8  }
  0x76   :  { %v1257_v15 = vpop.permute.xlu1 %1256  ;;  %v1247_v16 = vpop.permute.xlu0 %1246 }
  0x77   :  { %v1259_v20 = vunpack.i.h.bf16 %v1257_v15  ;;  %v1258_v21 = vunpack.i.l.bf16 %v1257_v15  ;;  %v1249_v22 = vunpack.i.h.bf16 %v1247_v16  ;;  %v1248_v23 = vunpack.i.l.bf16 %v1247_v16 }
  0x79   :  { %v70_v27 = vsel %vm2251_vm0, %v1248_v23, %v1249_v22  ;;  %v91_v28 = vsel %vm2252_vm2, %v1258_v21, %v1259_v20 }
  0x7a   :  { %v1262_v30 = vpop.permute.xlu1 %1261  ;;  %v1252_v31 = vpop.permute.xlu0 %1251  ;;  %v1090_v32 = vpack.c.bf16 %v91_v28, %v70_v27  ;;  %v2328_v28 = vmov 0 }
  0x7b   :  { %v1264_v35 = vunpack.i.h.bf16 %v1262_v30  ;;  %v1263_v36 = vunpack.i.l.bf16 %v1262_v30  ;;  %v1254_v37 = vunpack.i.h.bf16 %v1252_v31  ;;  %v1253_v38 = vunpack.i.l.bf16 %v1252_v31 }
  0x7c   :  { %1092 = vmatprep.subr.msk.bf16.mxu0 %vm1601_vm4, %v1090_v32  ;;  %vm2337_vm4 = vcmp.lt.s32.totalorder %v1575_v10, 127 }
  0x7d   :  { %v68_v42 = vsel %vm2251_vm0, %v1253_v38, %v1254_v37  ;;  %v89_v43 = vsel %vm2252_vm2, %v1263_v36, %v1264_v35  ;;  %v71_v45 = vsel %vm2251_vm0, %v1254_v37, %v1248_v23  ;;  %v92_v46 = vsel %vm2252_vm2, %v1264_v35, %v1258_v21 }
  0x7e   :  { %v1272_v47 = vpop.permute.xlu1 %1271  ;;  %v1267_v48 = vpop.permute.xlu0 %1266  ;;  %v1114_v49 = vpack.c.bf16 %v89_v43, %v68_v42  ;;  %v72_v50 = vsel %vm1605_vm5, %v71_v45, 0.0  ;;  %v69_v51 = vsel %vm2251_vm0, %v1249_v22, %v1253_v38  ;;  %v90_v52 = vsel %vm2252_vm2, %v1259_v20, %v1263_v36  ;;  %vm1707_vm0 = vmpackc.low %vm1586_vm1, %vm1662_vm14 }
  0x7f   :  { %v1274_v53 = vunpack.i.h.bf16 %v1272_v47  ;;  %v1273_v54 = vunpack.i.l.bf16 %v1272_v47  ;;  %v1269_v55 = vunpack.i.h.bf16 %v1267_v48  ;;  %v1268_v56 = vunpack.i.l.bf16 %v1267_v48 }
  0x80   :  { %1116 = vmatprep.subr.msk.bf16.mxu1 %vm1635_vm11, %v1114_v49  ;;  %v1093_v58 = vpack.c.bf16 %v92_v46, %v72_v50  ;;  %v74_v59 = vsel %vm1616_vm8, %v69_v51, 0.0  ;;  %vm1679_vm2 = vcmp.lt.s32.totalorder %v38_v19, 15  ;;  %v2322_v23 = vmov 0 }
  0x81   :  { %v107_v61 = vsel %vm2259_vm7, %v1269_v55, %v1273_v54  ;;  %v109_v62 = vsel %vm2259_vm7, %v1274_v53, %v1268_v56  ;;  %v2317_v3 = vsel %vm1679_vm2, 4294967295, %v2316_v3  ;;  %v1117_v8 = vpack.c.bf16 %v90_v52, %v74_v59 }
  0x82   :  { %1095 = vmatpush1.bf16.msk.msra.mxu0 %vm1653_vm12, %v1093_v58  ;;  %v1282_v9 = vpop.permute.xlu1 %1281  ;;  %v1277_v12 = vpop.permute.xlu0 %1276  ;;  %v106_v19 = vsel %vm2259_vm7, %v1273_v54, %v1274_v53  ;;  %v112_v20 = vsel %vm1616_vm8, %v107_v61, 0.0  ;;  %v108_v21 = vsel %vm2259_vm7, %v1268_v56, %v1269_v55  ;;  %v110_v22 = vsel %vm1605_vm5, %v109_v62, 0.0 }
  0x83   :  { %v1284_v14 = vunpack.i.h.bf16 %v1282_v9  ;;  %v1283_v15 = vunpack.i.l.bf16 %v1282_v9  ;;  %v1279_v16 = vunpack.i.h.bf16 %v1277_v12  ;;  %v1278_v18 = vunpack.i.l.bf16 %v1277_v12  ;;  %1119 = vmatpush1.bf16.msk.msra.mxu1 %vm1674_vm15, %v1117_v8  ;;  %vm1723_vm15 = vmpackc.low %vm1609_vm6, %vm1679_vm2 }
  0x84   :  { %v2323_v23 = vsel %vm1707_vm0, 4294967295, %v2322_v23  ;;  %vm2324_vm11 = vcmp.lt.s32.totalorder %v1575_v10, 1  ;;  %v2329_v28 = vsel %vm1723_vm15, 4294967295, %v2328_v28  ;;  %v2330_v38 = vmov 0 }
  0x85   :  { %v127_v24 = vsel %vm2324_vm11, %v1283_v15, %v1284_v14  ;;  %vm2325_vm12 = vmmov %vm2324_vm11  ;;  %v2332_v47 = vmov 0  ;;  %v32_v48 = vand.u32 255, %v1578_v11  ;;  %v34_v49 = vand.u32 255, %v1582_v13 }
  0x86   :  { %v128_v25 = vsel %vm2325_vm12, %v1279_v16, %v1283_v15  ;;  %vm2326_vm7 = vmmov %vm2324_vm11  ;;  %v1120_v30 = vpack.c.bf16 %v127_v24, %v106_v19  ;;  %v1292_v36 = vpop.permute.xlu1 %1291  ;;  %v1287_v37 = vpop.permute.xlu0 %1286  ;;  %vm2334_vm12 = vmmov 1   ;;  %v2335_v50 = vmov 0 }
  0x87   :  { %v129_v26 = vsel %vm2326_vm7, %v1278_v18, %v1279_v16  ;;  %vm2327_vm8 = vmmov %vm2326_vm7  ;;  %v1123_v35 = vpack.c.bf16 %v128_v25, %v112_v20  ;;  %v1294_v42 = vunpack.i.h.bf16 %v1292_v36  ;;  %v1293_v43 = vunpack.i.l.bf16 %v1292_v36 }
  0x88   :  { %v130_v27 = vsel %vm2327_vm8, %v1284_v14, %v1278_v18  ;;  %v1096_v31 = vpack.c.bf16 %v129_v26, %v108_v21  ;;  %vm1731_vm7 = vmpackc.low %vm1620_vm9, %vm1683_vm3  ;;  %v1289_v45 = vunpack.i.h.bf16 %v1287_v37  ;;  %v1288_v46 = vunpack.i.l.bf16 %v1287_v37  ;;  %1122 = vmatprep.subr.msk.bf16.mxu1 %vm1723_vm15, %v1120_v30 }
  0x89   :  { %v1099_v32 = vpack.c.bf16 %v130_v27, %v110_v22  ;;  %v2331_v38 = vsel %vm1731_vm7, 4294967295, %v2330_v38  ;;  %vm1739_vm8 = vmpackc.low %vm1624_vm10, %vm1689_vm13  ;;  %v144_v11 = vsel %vm2337_vm4, %v1293_v43, %v1294_v42  ;;  %v2341_v53 = vmov 0 }
  0x8a   :  { %v2333_v47 = vsel %vm1739_vm8, 4294967295, %v2332_v47  ;;  %1098 = vmatprep.subr.msk.bf16.mxu0 %vm1707_vm0, %v1096_v31  ;;  %vm1753_vm5 = vmpackc.low %vm1662_vm14, %vm2334_vm12  ;;  %v1129_v54 = vpack.c.bf16 %v144_v11, %v1537_v2  ;;  %1125 = vmatpush1.bf16.msk.msra.mxu1 %vm1739_vm8, %v1123_v35  ;;  %v1302_v59 = vpop.permute.xlu1 %1301  ;;  %v1297_v61 = vpop.permute.xlu0 %1296  ;;  %v2343_v62 = vmov 0  ;;  %vm2351_vm8 = vcmp.lt.s32.totalorder %v1575_v10, 113 }
  0x8b   :  { %v2336_v50 = vsel %vm1753_vm5, 4294967295, %v2335_v50  ;;  %vm2338_vm10 = vmmov %vm2337_vm4  ;;  %1101 = vmatpush1.bf16.msk.msra.mxu0 %vm1731_vm7, %v1099_v32  ;;  %v1304_v8 = vunpack.i.h.bf16 %v1302_v59  ;;  %v1303_v2 = vunpack.i.l.bf16 %v1302_v59  ;;  %v1299_v9 = vunpack.i.h.bf16 %v1297_v61 }
  0x8c   :  { %v145_v13 = vsel %vm2338_vm10, %v1289_v45, %v1293_v43  ;;  %vm2339_vm0 = vmmov %vm2337_vm4  ;;  %vm1798_vm10 = vcmp.lt.s32.totalorder %v32_v48, 240 }
  0x8d   :  { %v146_v51 = vsel %vm2339_vm0, %v1288_v46, %v1289_v45  ;;  %vm2340_vm15 = vmmov %vm2339_vm0  ;;  %v1102_v55 = vpack.c.bf16 %v145_v13, %v1532_v1  ;;  %v1298_v1 = vunpack.i.l.bf16 %v1297_v61  ;;  %v162_v14 = vsel %vm2351_vm8, %v1299_v9, %v1303_v2 }
  0x8e   :  { %v147_v52 = vsel %vm2340_vm15, %v1294_v42, %v1288_v46  ;;  %vm1770_vm11 = vmpackc.low %vm1679_vm2, %vm2334_vm12  ;;  %v1105_v56 = vpack.c.bf16 %v146_v51, %v1527_v0  ;;  %v2345_v0 = vmov 0  ;;  %vm1802_vm15 = vcmp.lt.s32.totalorder %v34_v49, 240  ;;  %v1312_v16 = vpop.permute.xlu1 %1311  ;;  %v1307_v18 = vpop.permute.xlu0 %1306 }
  0x8f   :  { %v2342_v53 = vsel %vm1770_vm11, 4294967295, %v2341_v53  ;;  %v1126_v58 = vpack.c.bf16 %v147_v52, %v1544_v4  ;;  %vm1783_vm0 = vmpackc.low %vm1683_vm3, %vm2334_vm12  ;;  %1104 = vmatprep.subr.msk.bf16.mxu0 %vm1753_vm5, %v1102_v55  ;;  %v1314_v19 = vunpack.i.h.bf16 %v1312_v16  ;;  %v1313_v20 = vunpack.i.l.bf16 %v1312_v16 }
  0x90   :  { %v2344_v62 = vsel %vm1783_vm0, 4294967295, %v2343_v62  ;;  %vm1790_vm4 = vmpackc.low %vm1689_vm13, %vm2334_vm12  ;;  %1107 = vmatpush1.bf16.msk.msra.mxu0 %vm1783_vm0, %v1105_v56  ;;  %v1309_v21 = vunpack.i.h.bf16 %v1307_v18  ;;  %v1308_v22 = vunpack.i.l.bf16 %v1307_v18  ;;  %v166_v26 = vsel %vm1798_vm10, %v162_v14, 0.0 }
  0x91   :  { %v2346_v0 = vsel %vm1790_vm4, 4294967295, %v2345_v0  ;;  %1128 = vmatprep.subr.msk.bf16.mxu1 %vm1770_vm11, %v1126_v58  ;;  %vm2352_vm7 = vmmov %vm2351_vm8 }
  0x92   :  { %v164_v15 = vsel %vm2352_vm7, %v1304_v8, %v1298_v1  ;;  %1131 = vmatpush1.bf16.msk.msra.mxu1 %vm1790_vm4, %v1129_v54  ;;  %vm1819_vm8 = vmpackc.low %vm1798_vm10, %vm1586_vm1  ;;  %v161_v25 = vsel %vm2352_vm7, %v1303_v2, %v1304_v8  ;;  %vm2358_vm4 = vcmp.lt.s32.totalorder %v1575_v10, 112  ;;  %v193_v46 = vpop.permute.xlu1 %192  ;;  %v191_v48 = vpop.permute.xlu0 %190  ;;  %v211_v54 = vld [vmem:[%s2245_s1] sm:$0xff] }
  0x93   :  { %vm2355_vm11 = vmmov %vm2352_vm7  ;;  %v168_v30 = vsel %vm1802_vm15, %v164_v15, 0.0  ;;  %v182_v31 = vsel %vm2358_vm4, %v1313_v20, %v1314_v19 }
  0x94   :  { %v163_v27 = vsel %vm2355_vm11, %v1298_v1, %v1299_v9  ;;  %vm1835_vm1 = vmpackc.low %vm1802_vm15, %vm1609_vm6  ;;  %v1135_v37 = vpack.c.bf16 %v182_v31, %v161_v25  ;;  %vm2364_vm6 = vnez %v2307_v41  ;;  %v513_v25 = vld [vmem:[%s2246_s4] sm:$0xff] }
  0x95   :  { %vm2359_vm7 = vmmov %vm2358_vm4 }
  0x96   :  { %v183_v32 = vsel %vm2359_vm7, %v1309_v21, %v1313_v20  ;;  %vm2360_vm0 = vmmov %vm2358_vm4  ;;  %v197_v40 = vpop.permute.xlu1 %196  ;;  %v195_v41 = vpop.permute.xlu0 %194  ;;  %vm2367_vm4 = vcmp.lt.s32.totalorder %v1575_v10, 16  ;;  %vm2368_vm7 = vcmp.lt.s32.totalorder %v1575_v10, 17 }
  0x97   :  { %v184_v35 = vsel %vm2360_vm0, %v1308_v22, %v1309_v21  ;;  %vm2361_vm11 = vmmov %vm2360_vm0  ;;  %v1108_v42 = vpack.c.bf16 %v183_v32, %v166_v26 }
  0x98   :  { %v185_v36 = vsel %vm2361_vm11, %v1314_v19, %v1308_v22  ;;  %vm1850_vm5 = vmpackc.low %vm2334_vm12, %vm1620_vm9  ;;  %v1111_v43 = vpack.c.bf16 %v184_v35, %v163_v27  ;;  %vm2286_vm9 = vcmp.lt.s32.totalorder %v1575_v10, 111  ;;  %vm2369_vm11 = vnez %v2297_v29 }
  0x99   :  { %v1132_v45 = vpack.c.bf16 %v185_v36, %v168_v30  ;;  %vm1857_vm0 = vmpackc.low %vm2334_vm12, %vm2364_vm6  ;;  %1110 = vmatprep.subr.msk.bf16.mxu0 %vm1819_vm8, %v1108_v42  ;;  %v202_v11 = vsel %vm2286_vm9, %v197_v40, %v191_v48  ;;  %v200_v13 = vsel %vm2286_vm9, %v193_v46, %v195_v41  ;;  %vm2285_vm12 = vcmask 588800  }
  0x9a   :  { %1113 = vmatpush1.bf16.msk.msra.mxu0 %vm1850_vm5, %v1111_v43  ;;  %v206_v51 = vsel %vm1802_vm15, %v202_v11, 0.0  ;;  %v204_v52 = vsel %vm1798_vm10, %v200_v13, 0.0  ;;  %v201_v55 = vsel %vm2286_vm9, %v191_v48, %v193_v46  ;;  %v199_v56 = vsel %vm2286_vm9, %v195_v41, %v197_v40  ;;  %vm2370_vm6 = vmmov %vm2368_vm7 }
  0x9b   :  { %1134 = vmatprep.subr.msk.bf16.mxu1 %vm1835_vm1, %v1132_v45  ;;  %1008 = vmatprep.subr.msk.mxu0 %vm1662_vm14, %v204_v52  ;;  %vm2374_vm9 = vnez %v2299_v33 }
  0x9c   :  { %1137 = vmatpush1.bf16.msk.msra.mxu1 %vm1857_vm0, %v1135_v37 }
  0x9d   :  { %1023 = vmatprep.subr.msk.mxu1 %vm1679_vm2, %v206_v51  ;;  %vm2385_vm2 = vnez %v2315_v63 }
  0x9e   :  { %1009 = vmatpush1.msk.msra.mxu0 %vm1683_vm3, %v201_v55 }
  0x9f   :  { %1010 = vmatmul.mubr.msk.f32.vlgmr.msra.gmra.mrb[0].mxu0 %vm2285_vm12, %v211_v54 }
  0xa0   :  { %1024 = vmatpush1.msk.msra.mxu1 %vm1689_vm13, %v199_v56  ;;  %586 = vmatprep.mubr.f32.mxu0 %v1479_v6 }
  0xa1   :  { %1025 = vmatmul.mubr.msk.f32.vlgmr.msra.gmra.mrb[0].mxu1 %vm2285_vm12, %v211_v54  ;;  %vm2371_vm12 = vmmov %vm2370_vm6 }
  0xa2   :  { %657 = vmatprep.mubr.f32.mxu1 %v1479_v6 }
  0xa7   :  { %v216_v58 = vpop.permute.xlu0 %215 }
 0x172   :  { %v288_v59 = vpop.f32.mrb[0].mxu0 }
 0x173   :  { %v289_v8 = vadd.f32 %v288_v59, %v216_v58  ;;  %v290_v2 = vpop.f32.mrb[1].mxu0 }
 0x174   :  { %v359_v61 = vpop.f32.mrb[0].mxu1  ;;  %v291_v14 = vadd.f32 %v290_v2, %v216_v58 }
 0x175   :  { %v361_v9 = vpop.f32.mrb[1].mxu1  ;;  %v360_v1 = vadd.f32 %v359_v61, %v216_v58  ;;  %v1897_v16 = vmax.f32 %v289_v8, 0.0 }
 0x176   :  { %v362_v15 = vadd.f32 %v361_v9, %v216_v58  ;;  %v1899_v18 = vmax.f32 %v291_v14, 0.0 }
 0x177   :  { %v1901_v19 = vmax.f32 %v360_v1, 0.0 }
 0x178   :  { %v1903_v20 = vmax.f32 %v362_v15, 0.0  ;;  %v1326_v21 = vpack.i.bf16 %v1899_v18, %v1897_v16 }
 0x17a   :  { %1327 = vrot.lane.b32.xlu0 %v1326_v21, %s1473_s9  ;;  %1317 = vrot.lane.b32.xlu1 %v1326_v21, %s1474_s10  ;;  %v1321_v22 = vpack.i.bf16 %v1903_v20, %v1901_v19 }
 0x17e   :  { %1337 = vrot.lane.b32.xlu0 %v1326_v21, %s1475_s11  ;;  %1322 = vrot.lane.b32.xlu1 %v1321_v22, %s1474_s10 }
 0x182   :  { %1347 = vrot.lane.b32.xlu0 %v1326_v21, %s1476_s0  ;;  %1332 = vrot.lane.b32.xlu1 %v1321_v22, %s1473_s9 }
 0x186   :  { %1357 = vrot.lane.b32.xlu0 %v1326_v21, %s1477_s12  ;;  %1342 = vrot.lane.b32.xlu1 %v1321_v22, %s1475_s11 }
 0x18a   :  { %1367 = vrot.lane.b32.xlu0 %v1326_v21, %s1478_s13  ;;  %1352 = vrot.lane.b32.xlu1 %v1321_v22, %s1476_s0 }
 0x18e   :  { %1377 = vrot.lane.b32.xlu0 %v1326_v21, %s1480_s14  ;;  %1362 = vrot.lane.b32.xlu1 %v1321_v22, %s1477_s12 }
 0x192   :  { %492 = vrot.lane.b32.xlu0 %v1897_v16, %s1482_s15  ;;  %1372 = vrot.lane.b32.xlu1 %v1321_v22, %s1478_s13 }
 0x196   :  { %496 = vrot.lane.b32.xlu0 %v1901_v19, %s1482_s15  ;;  %1382 = vrot.lane.b32.xlu1 %v1321_v22, %s1480_s14 }
 0x19a   :  { %516 = vperm.xlu0 %1315, %v513_v25   ;;  %494 = vrot.lane.b32.xlu1 %v1899_v18, %s1482_s15 }
 0x19e   :  { %498 = vrot.lane.b32.xlu1 %v1903_v20, %s1482_s15 }
 0x1ec   :  { %v1328_v26 = vpop.permute.xlu0 %1327  ;;  %v1318_v27 = vpop.permute.xlu1 %1317 }
 0x1ed   :  { %v1330_v30 = vunpack.i.h.bf16 %v1328_v26  ;;  %v1329_v31 = vunpack.i.l.bf16 %v1328_v26  ;;  %v1320_v32 = vunpack.i.h.bf16 %v1318_v27  ;;  %v1319_v35 = vunpack.i.l.bf16 %v1318_v27 }
 0x1ef   :  { %v398_v36 = vsel %vm2367_vm4, %v1329_v31, %v1330_v30  ;;  %v378_v37 = vsel %vm2368_vm7, %v1319_v35, %v1320_v32  ;;  %vm2372_vm4 = vcmp.lt.s32.totalorder %v1575_v10, 15  ;;  %vm2373_vm7 = vmmov %vm2370_vm6 }
 0x1f0   :  { %v1138_v42 = vpack.c.bf16 %v398_v36, %v378_v37  ;;  %v1338_v43 = vpop.permute.xlu0 %1337  ;;  %v1323_v45 = vpop.permute.xlu1 %1322 }
 0x1f1   :  { %v1325_v46 = vunpack.i.h.bf16 %v1323_v45  ;;  %v1324_v48 = vunpack.i.l.bf16 %v1323_v45  ;;  %v1340_v40 = vunpack.i.h.bf16 %v1338_v43  ;;  %v1339_v41 = vunpack.i.l.bf16 %v1338_v43 }
 0x1f2   :  { %1140 = vmatprep.subr.msk.bf16.mxu0 %vm2369_vm11, %v1138_v42  ;;  %vm2377_vm11 = vcmp.lt.s32.totalorder %v1575_v10, 16 }
 0x1f3   :  { %v377_v11 = vsel %vm2370_vm6, %v1320_v32, %v1324_v48  ;;  %v379_v13 = vsel %vm2371_vm12, %v1325_v46, %v1319_v35  ;;  %v414_v59 = vsel %vm2372_vm4, %v1339_v41, %v1340_v40  ;;  %v376_v61 = vsel %vm2373_vm7, %v1324_v48, %v1325_v46  ;;  %vm2378_vm13 = vmmov %vm2377_vm11 }
 0x1f4   :  { %v1348_v51 = vpop.permute.xlu0 %1347  ;;  %v1333_v52 = vpop.permute.xlu1 %1332  ;;  %v380_v8 = vsel %vm2374_vm9, %v379_v13, 0.0  ;;  %vm2375_vm6 = vnez %v2303_v39  ;;  %vm2376_vm12 = vcmp.lt.s32.totalorder %v1575_v10, 1  ;;  %vm2379_vm4 = vmmov %vm2377_vm11  ;;  %vm2380_vm7 = vnez %v2311_v57 }
 0x1f5   :  { %v1350_v54 = vunpack.i.h.bf16 %v1348_v51  ;;  %v1349_v55 = vunpack.i.l.bf16 %v1348_v51  ;;  %v1335_v56 = vunpack.i.h.bf16 %v1333_v52  ;;  %v1334_v58 = vunpack.i.l.bf16 %v1333_v52 }
 0x1f6   :  { %v382_v2 = vsel %vm2375_vm6, %v377_v11, 0.0 }
 0x1f7   :  { %v434_v9 = vsel %vm2376_vm12, %v1349_v55, %v1350_v54  ;;  %v399_v1 = vsel %vm2377_vm11, %v1335_v56, %v1329_v31  ;;  %v396_v14 = vsel %vm2378_vm13, %v1334_v58, %v1335_v56  ;;  %v397_v15 = vsel %vm2379_vm4, %v1330_v30, %v1334_v58 }
 0x1f8   :  { %v1144_v21 = vpack.c.bf16 %v434_v9, %v414_v59  ;;  %v1141_v22 = vpack.c.bf16 %v399_v1, %v380_v8  ;;  %v1162_v25 = vpack.c.bf16 %v396_v14, %v376_v61  ;;  %v1165_v26 = vpack.c.bf16 %v397_v15, %v382_v2  ;;  %v1358_v27 = vpop.permute.xlu0 %1357  ;;  %v1343_v32 = vpop.permute.xlu1 %1342 }
 0x1f9   :  { %v1345_v35 = vunpack.i.h.bf16 %v1343_v32  ;;  %v1344_v36 = vunpack.i.l.bf16 %v1343_v32  ;;  %vm2381_vm12 = vnez %v2309_v44  ;;  %vm2382_vm11 = vcmp.lt.s32.totalorder %v1575_v10, 15 }
 0x1fa   :  { %1143 = vmatpush1.bf16.msk.msra.mxu0 %vm2380_vm7, %v1141_v22  ;;  %1164 = vmatprep.subr.msk.bf16.mxu1 %vm2381_vm12, %v1162_v25  ;;  %vm2383_vm13 = vnez %v2323_v23  ;;  %vm2384_vm4 = vmmov %vm2382_vm11  ;;  %v1360_v46 = vunpack.i.h.bf16 %v1358_v27  ;;  %v1359_v48 = vunpack.i.l.bf16 %v1358_v27  ;;  %vm2391_vm12 = vnez %v2331_v38 }
 0x1fb   :  { %v415_v31 = vsel %vm2382_vm11, %v1345_v35, %v1339_v41  ;;  %1146 = vmatprep.subr.msk.bf16.mxu0 %vm2383_vm13, %v1144_v21  ;;  %v413_v30 = vsel %vm2384_vm4, %v1340_v40, %v1344_v36  ;;  %1167 = vmatpush1.bf16.msk.msra.mxu1 %vm2385_vm2, %v1165_v26  ;;  %vm2386_vm11 = vmmov %vm2384_vm4  ;;  %vm2387_vm4 = vcmp.lt.s32.totalorder %v1575_v10, 1 }
 0x1fc   :  { %v1368_v37 = vpop.permute.xlu0 %1367  ;;  %v1353_v42 = vpop.permute.xlu1 %1352  ;;  %v416_v11 = vsel %vm2374_vm9, %v415_v31, 0.0  ;;  %v412_v41 = vsel %vm2386_vm11, %v1344_v36, %v1345_v35  ;;  %v418_v13 = vsel %vm2375_vm6, %v413_v30, 0.0  ;;  %vm2388_vm13 = vmmov %vm2387_vm4  ;;  %vm2390_vm11 = vcmp.lt.s32.totalorder %v1575_v10, 127 }
 0x1fd   :  { %v1355_v43 = vunpack.i.h.bf16 %v1353_v42  ;;  %v1354_v45 = vunpack.i.l.bf16 %v1353_v42  ;;  %vm2389_vm2 = vmmov %vm2387_vm4  ;;  %v450_v1 = vsel %vm2390_vm11, %v1359_v48, %v1360_v46  ;;  %vm2396_vm6 = vnez %v2333_v47 }
 0x1fe   :  { %v1153_v26 = vpack.c.bf16 %v450_v1, %v1897_v16  ;;  %v1369_v27 = vunpack.i.l.bf16 %v1368_v37  ;;  %v1370_v36 = vunpack.i.h.bf16 %v1368_v37 }
 0x1ff   :  { %v435_v40 = vsel %vm2387_vm4, %v1355_v43, %v1349_v55  ;;  %v432_v51 = vsel %vm2388_vm13, %v1354_v45, %v1355_v43  ;;  %v433_v52 = vsel %vm2389_vm2, %v1350_v54, %v1354_v45  ;;  %vm2392_vm4 = vnez %v2329_v28  ;;  %vm2393_vm13 = vmmov %vm2390_vm11 }
 0x200   :  { %v1147_v56 = vpack.c.bf16 %v435_v40, %v416_v11  ;;  %v1168_v58 = vpack.c.bf16 %v432_v51, %v412_v41  ;;  %v1171_v59 = vpack.c.bf16 %v433_v52, %v418_v13  ;;  %v1378_v61 = vpop.permute.xlu0 %1377  ;;  %v1363_v8 = vpop.permute.xlu1 %1362  ;;  %vm2394_vm2 = vmmov %vm2390_vm11  ;;  %vm2398_vm11 = vnez %v2342_v53 }
 0x201   :  { %v1365_v2 = vunpack.i.h.bf16 %v1363_v8  ;;  %v1364_v9 = vunpack.i.l.bf16 %v1363_v8  ;;  %vm2395_vm7 = vmmov %vm2394_vm2  ;;  %v1380_v31 = vunpack.i.h.bf16 %v1378_v61  ;;  %v1379_v30 = vunpack.i.l.bf16 %v1378_v61 }
 0x202   :  { %1149 = vmatpush1.bf16.msk.msra.mxu0 %vm2391_vm12, %v1147_v56  ;;  %1170 = vmatprep.subr.msk.bf16.mxu1 %vm2392_vm4, %v1168_v58 }
 0x203   :  { %v451_v55 = vsel %vm2393_vm13, %v1365_v2, %v1359_v48  ;;  %v448_v54 = vsel %vm2394_vm2, %v1364_v9, %v1365_v2  ;;  %v449_v14 = vsel %vm2395_vm7, %v1360_v46, %v1364_v9  ;;  %1173 = vmatpush1.bf16.msk.msra.mxu1 %vm2396_vm6, %v1171_v59  ;;  %vm2397_vm7 = vnez %v2336_v50 }
 0x204   :  { %v1174_v15 = vpack.c.bf16 %v451_v55, %v1903_v20  ;;  %v1150_v21 = vpack.c.bf16 %v449_v14, %v1899_v18  ;;  %v1177_v22 = vpack.c.bf16 %v448_v54, %v1901_v19  ;;  %v1373_v25 = vpop.permute.xlu1 %1372  ;;  %v493_v42 = vpop.permute.xlu0 %492  ;;  %vm2399_vm13 = vcmp.lt.s32.totalorder %v1575_v10, 113  ;;  %v512_v55 = vld [vmem:[%s2247_s3] sm:$0xff] }
 0x205   :  { %v1375_v32 = vunpack.i.h.bf16 %v1373_v25  ;;  %v1374_v35 = vunpack.i.l.bf16 %v1373_v25  ;;  %vm2400_vm2 = vnez %v2344_v62  ;;  %vm2401_vm6 = vnez %v2346_v0  ;;  %vm2402_vm4 = vmmov %vm2399_vm13 }
 0x206   :  { %1152 = vmatprep.subr.msk.bf16.mxu0 %vm2397_vm7, %v1150_v21  ;;  %1176 = vmatprep.subr.msk.bf16.mxu1 %vm2398_vm11, %v1174_v15  ;;  %vm2403_vm7 = vcmp.lt.s32.totalorder %v1575_v10, 112 }
 0x207   :  { %v467_v18 = vsel %vm2399_vm13, %v1375_v32, %v1369_v27  ;;  %1155 = vmatpush1.bf16.msk.msra.mxu0 %vm2400_vm2, %v1153_v26  ;;  %1179 = vmatpush1.bf16.msk.msra.mxu1 %vm2401_vm6, %v1177_v22  ;;  %v465_v16 = vsel %vm2402_vm4, %v1370_v36, %v1374_v35  ;;  %v486_v43 = vsel %vm2403_vm7, %v1379_v30, %v1380_v31  ;;  %vm2404_vm13 = vmmov %vm2402_vm4 }
 0x208   :  { %v1383_v19 = vpop.permute.xlu1 %1382  ;;  %v471_v45 = vsel %vm1802_vm15, %v467_v18, 0.0  ;;  %v464_v46 = vsel %vm2404_vm13, %v1374_v35, %v1375_v32  ;;  %v469_v48 = vsel %vm1798_vm10, %v465_v16, 0.0  ;;  %vm2405_vm6 = vmmov %vm2403_vm7  ;;  %v497_v51 = vpop.permute.xlu0 %496 }
 0x209   :  { %v1385_v20 = vunpack.i.h.bf16 %v1383_v19  ;;  %v1384_v37 = vunpack.i.l.bf16 %v1383_v19  ;;  %vm2406_vm4 = vmmov %vm2405_vm6 }
 0x20a   :  { %vm2407_vm2 = vmmov %vm2406_vm4 }
 0x20b   :  { %v487_v11 = vsel %vm2405_vm6, %v1385_v20, %v1379_v30  ;;  %v484_v41 = vsel %vm2406_vm4, %v1384_v37, %v1385_v20  ;;  %v485_v13 = vsel %vm2407_vm2, %v1380_v31, %v1384_v37  ;;  %vm2408_vm7 = vmmov %vm2404_vm13  ;;  %vm2409_vm13 = vcmp.lt.s32.totalorder %v1575_v10, 111  ;;  %v813_v20 = vld [vmem:[%s2248_s6] sm:$0xff] }
 0x20c   :  { %v466_v40 = vsel %vm2408_vm7, %v1369_v27, %v1370_v36  ;;  %v1156_v52 = vpack.c.bf16 %v485_v13, %v469_v48  ;;  %v1180_v56 = vpack.c.bf16 %v487_v11, %v471_v45  ;;  %v1183_v58 = vpack.c.bf16 %v484_v41, %v464_v46  ;;  %v495_v59 = vpop.permute.xlu1 %494  ;;  %vm2410_vm6 = vmmov %vm2409_vm13 }
 0x20d   :  { %v1159_v61 = vpack.c.bf16 %v486_v43, %v466_v40  ;;  %v501_v8 = vsel %vm2409_vm13, %v495_v59, %v497_v51  ;;  %vm2411_vm2 = vmmov %vm2410_vm6  ;;  %vm2413_vm7 = vnez %v2317_v3  ;;  %vm2414_vm13 = vcmask 588800  }
 0x20e   :  { %v505_v2 = vsel %vm1798_vm10, %v501_v8, 0.0  ;;  %1158 = vmatprep.subr.msk.bf16.mxu0 %vm1819_vm8, %v1156_v52  ;;  %1182 = vmatprep.subr.msk.bf16.mxu1 %vm1835_vm1, %v1180_v56  ;;  %v502_v54 = vsel %vm2411_vm2, %v493_v42, %v495_v59  ;;  %vm2412_vm4 = vmmov %vm2411_vm2 }
 0x20f   :  { %1161 = vmatpush1.bf16.msk.msra.mxu0 %vm1850_vm5, %v1159_v61  ;;  %1185 = vmatpush1.bf16.msk.msra.mxu1 %vm1857_vm0, %v1183_v58 }
 0x210   :  { %v499_v9 = vpop.permute.xlu1 %498  ;;  %1038 = vmatprep.subr.msk.mxu0 %vm1662_vm14, %v505_v2  ;;  %vm2416_vm14 = vmmov %vm2414_vm13 }
 0x211   :  { %v503_v1 = vsel %vm2410_vm6, %v499_v9, %v493_v42  ;;  %v500_v15 = vsel %vm2412_vm4, %v497_v51, %v499_v9  ;;  %vm2415_vm6 = vnez %v2321_v7 }
 0x212   :  { %v507_v14 = vsel %vm1802_vm15, %v503_v1, 0.0 }
 0x213   :  { %1039 = vmatpush1.msk.msra.mxu0 %vm1683_vm3, %v502_v54  ;;  %1053 = vmatprep.subr.msk.mxu1 %vm2413_vm7, %v507_v14  ;;  %vm2431_vm3 = vnez %v2315_v63 }
 0x214   :  { %1040 = vmatmul.mubr.msk.f32.vlgmr.msra.gmra.mrb[2].mxu0 %vm2414_vm13, %v512_v55  ;;  %1054 = vmatpush1.msk.msra.mxu1 %vm2415_vm6, %v500_v15 }
 0x215   :  { %1055 = vmatmul.mubr.msk.f32.vlgmr.msra.gmra.mrb[2].mxu1 %vm2416_vm14, %v512_v55  ;;  %886 = vmatprep.mubr.f32.mxu0 %v1479_v6  ;;  %vm2417_vm14 = vcmp.lt.s32.totalorder %v1575_v10, 17 }
 0x216   :  { %957 = vmatprep.mubr.f32.mxu1 %v1479_v6  ;;  %vm2418_vm2 = vmmov %vm2417_vm14 }
 0x217   :  { %vm2419_vm4 = vmmov %vm2418_vm2 }
 0x218   :  { %vm2420_vm13 = vmmov %vm2418_vm2 }
 0x219   :  { %v517_v21 = vpop.permute.xlu0 %516 }
 0x2e7   :  { %v588_v22 = vpop.f32.mrb[2].mxu0 }
 0x2e8   :  { %v589_v25 = vadd.f32 %v588_v22, %v517_v21  ;;  %v590_v26 = vpop.f32.mrb[3].mxu0  ;;  %v659_v27 = vpop.f32.mrb[2].mxu1 }
 0x2e9   :  { %v591_v32 = vadd.f32 %v590_v26, %v517_v21  ;;  %v660_v35 = vadd.f32 %v659_v27, %v517_v21  ;;  %v661_v36 = vpop.f32.mrb[3].mxu1 }
 0x2ea   :  { %v2065_v31 = vmax.f32 %v589_v25, 0.0  ;;  %v662_v30 = vadd.f32 %v661_v36, %v517_v21 }
 0x2eb   :  { %v2067_v42 = vmax.f32 %v591_v32, 0.0  ;;  %v2069_v18 = vmax.f32 %v660_v35, 0.0 }
 0x2ec   :  { %v2071_v16 = vmax.f32 %v662_v30, 0.0 }
 0x2ed   :  { %v1386_v6 = vpack.i.bf16 %v2067_v42, %v2065_v31 }
 0x2ee   :  { %v1391_v19 = vpack.i.bf16 %v2071_v16, %v2069_v18 }
 0x2ef   :  { %1387 = vrot.lane.b32.xlu1 %v1386_v6, %s1474_s10 }
 0x2f0   :  { %1392 = vrot.lane.b32.xlu0 %v1391_v19, %s1474_s10 }
 0x2f3   :  { %1397 = vrot.lane.b32.xlu1 %v1386_v6, %s1473_s9 }
 0x2f4   :  { %1402 = vrot.lane.b32.xlu0 %v1391_v19, %s1473_s9 }
 0x2f7   :  { %1407 = vrot.lane.b32.xlu1 %v1386_v6, %s1475_s11 }
 0x2f8   :  { %1412 = vrot.lane.b32.xlu0 %v1391_v19, %s1475_s11 }
 0x2fb   :  { %1417 = vrot.lane.b32.xlu1 %v1386_v6, %s1476_s0 }
 0x2fc   :  { %1422 = vrot.lane.b32.xlu0 %v1391_v19, %s1476_s0 }
 0x2ff   :  { %1427 = vrot.lane.b32.xlu1 %v1386_v6, %s1477_s12 }
 0x300   :  { %1432 = vrot.lane.b32.xlu0 %v1391_v19, %s1477_s12 }
 0x303   :  { %1437 = vrot.lane.b32.xlu1 %v1386_v6, %s1478_s13 }
 0x304   :  { %1442 = vrot.lane.b32.xlu0 %v1391_v19, %s1478_s13 }
 0x307   :  { %1447 = vrot.lane.b32.xlu1 %v1386_v6, %s1480_s14 }
 0x308   :  { %1452 = vrot.lane.b32.xlu0 %v1391_v19, %s1480_s14 }
 0x30b   :  { %792 = vrot.lane.b32.xlu1 %v2065_v31, %s1482_s15 }
 0x30c   :  { %794 = vrot.lane.b32.xlu0 %v2067_v42, %s1482_s15 }
 0x30f   :  { %796 = vrot.lane.b32.xlu1 %v2069_v18, %s1482_s15 }
 0x310   :  { %798 = vrot.lane.b32.xlu0 %v2071_v16, %s1482_s15 }
 0x313   :  { %816 = vperm.xlu1 %1456, %v813_v20  }
 0x361   :  { %v1388_v37 = vpop.permute.xlu1 %1387 }
 0x362   :  { %v1390_v43 = vunpack.i.h.bf16 %v1388_v37  ;;  %v1389_v45 = vunpack.i.l.bf16 %v1388_v37  ;;  %v1393_v46 = vpop.permute.xlu0 %1392 }
 0x363   :  { %v1395_v48 = vunpack.i.h.bf16 %v1393_v46  ;;  %v1394_v11 = vunpack.i.l.bf16 %v1393_v46 }
 0x364   :  { %v678_v58 = vsel %vm2419_vm4, %v1389_v45, %v1390_v43 }
 0x365   :  { %v677_v41 = vsel %vm2417_vm14, %v1390_v43, %v1394_v11  ;;  %v679_v13 = vsel %vm2418_vm2, %v1395_v48, %v1389_v45  ;;  %v1398_v40 = vpop.permute.xlu1 %1397  ;;  %v676_v8 = vsel %vm2420_vm13, %v1394_v11, %v1395_v48  ;;  %vm2421_vm14 = vnez %v2303_v39 }
 0x366   :  { %v1400_v51 = vunpack.i.h.bf16 %v1398_v40  ;;  %v1399_v52 = vunpack.i.l.bf16 %v1398_v40  ;;  %v1403_v56 = vpop.permute.xlu0 %1402  ;;  %v680_v2 = vsel %vm2374_vm9, %v679_v13, 0.0  ;;  %v682_v9 = vsel %vm2421_vm14, %v677_v41, 0.0 }
 0x367   :  { %v1405_v59 = vunpack.i.h.bf16 %v1403_v56  ;;  %v1404_v61 = vunpack.i.l.bf16 %v1403_v56  ;;  %vm2422_vm2 = vcmp.lt.s32.totalorder %v1575_v10, 16  ;;  %vm2426_vm13 = vnez %v2297_v29 }
 0x368   :  { %v698_v1 = vsel %vm2422_vm2, %v1399_v52, %v1400_v51  ;;  %vm2423_vm6 = vmmov %vm2422_vm2 }
 0x369   :  { %v1186_v55 = vpack.c.bf16 %v698_v1, %v678_v58  ;;  %v696_v54 = vsel %vm2423_vm6, %v1404_v61, %v1405_v59  ;;  %vm2424_vm4 = vmmov %vm2422_vm2  ;;  %v1408_v21 = vpop.permute.xlu1 %1407  ;;  %vm2427_vm6 = vnez %v2311_v57 }
 0x36a   :  { %v697_v14 = vsel %vm2424_vm4, %v1400_v51, %v1404_v61  ;;  %vm2425_vm7 = vmmov %vm2422_vm2  ;;  %v1210_v25 = vpack.c.bf16 %v696_v54, %v676_v8  ;;  %v1410_v27 = vunpack.i.h.bf16 %v1408_v21  ;;  %v1413_v32 = vpop.permute.xlu0 %1412  ;;  %v1409_v35 = vunpack.i.l.bf16 %v1408_v21 }
 0x36b   :  { %v699_v15 = vsel %vm2425_vm7, %v1405_v59, %v1399_v52  ;;  %v1213_v26 = vpack.c.bf16 %v697_v14, %v682_v9  ;;  %v1415_v36 = vunpack.i.h.bf16 %v1413_v32  ;;  %v1414_v30 = vunpack.i.l.bf16 %v1413_v32  ;;  %1188 = vmatprep.subr.msk.bf16.mxu0 %vm2426_vm13, %v1186_v55 }
 0x36c   :  { %v1189_v22 = vpack.c.bf16 %v699_v15, %v680_v2  ;;  %vm2428_vm2 = vnez %v2309_v44  ;;  %vm2429_vm7 = vcmp.lt.s32.totalorder %v1575_v10, 15 }
 0x36d   :  { %1212 = vmatprep.subr.msk.bf16.mxu1 %vm2428_vm2, %v1210_v25  ;;  %v713_v6 = vsel %vm2429_vm7, %v1410_v27, %v1414_v30  ;;  %vm2430_vm4 = vmmov %vm2429_vm7  ;;  %v1418_v20 = vpop.permute.xlu1 %1417  ;;  %vm2434_vm2 = vcmp.lt.s32.totalorder %v1575_v10, 1 }
 0x36e   :  { %1191 = vmatpush1.bf16.msk.msra.mxu0 %vm2427_vm6, %v1189_v22  ;;  %v715_v19 = vsel %vm2430_vm4, %v1415_v36, %v1409_v35  ;;  %1215 = vmatpush1.bf16.msk.msra.mxu1 %vm2431_vm3, %v1213_v26  ;;  %v1420_v37 = vunpack.i.h.bf16 %v1418_v20  ;;  %v1419_v43 = vunpack.i.l.bf16 %v1418_v20  ;;  %v1423_v29 = vpop.permute.xlu0 %1422  ;;  %vm2432_vm13 = vmmov %vm2430_vm4  ;;  %v718_v11 = vsel %vm2421_vm14, %v713_v6, 0.0 }
 0x36f   :  { %v714_v57 = vsel %vm2432_vm13, %v1409_v35, %v1410_v27  ;;  %v1425_v45 = vunpack.i.h.bf16 %v1423_v29  ;;  %v1424_v46 = vunpack.i.l.bf16 %v1423_v29  ;;  %vm2433_vm6 = vmmov %vm2430_vm4  ;;  %v716_v48 = vsel %vm2374_vm9, %v715_v19, 0.0 }
 0x370   :  { %v712_v44 = vsel %vm2433_vm6, %v1414_v30, %v1415_v36  ;;  %v734_v63 = vsel %vm2434_vm2, %v1419_v43, %v1420_v37  ;;  %vm2435_vm3 = vmmov %vm2434_vm2  ;;  %vm2438_vm9 = vnez %v2323_v23  ;;  %vm2439_vm14 = vnez %v2329_v28 }
 0x371   :  { %v1192_v41 = vpack.c.bf16 %v734_v63, %v714_v57  ;;  %v732_v13 = vsel %vm2435_vm3, %v1424_v46, %v1425_v45  ;;  %vm2436_vm7 = vmmov %vm2434_vm2  ;;  %v1428_v52 = vpop.permute.xlu1 %1427  ;;  %vm2440_vm13 = vcmp.lt.s32.totalorder %v1575_v10, 127 }
 0x372   :  { %v733_v40 = vsel %vm2436_vm7, %v1420_v37, %v1424_v46  ;;  %vm2437_vm4 = vmmov %vm2434_vm2  ;;  %v1216_v33 = vpack.c.bf16 %v732_v13, %v712_v44  ;;  %v1430_v59 = vunpack.i.h.bf16 %v1428_v52  ;;  %v1433_v39 = vpop.permute.xlu0 %1432  ;;  %v1429_v61 = vunpack.i.l.bf16 %v1428_v52 }
 0x373   :  { %v735_v51 = vsel %vm2437_vm4, %v1425_v45, %v1419_v43  ;;  %v1219_v58 = vpack.c.bf16 %v733_v40, %v718_v11  ;;  %v1435_v8 = vunpack.i.h.bf16 %v1433_v39  ;;  %v1434_v2 = vunpack.i.l.bf16 %v1433_v39  ;;  %1194 = vmatprep.subr.msk.bf16.mxu0 %vm2438_vm9, %v1192_v41  ;;  %vm2441_vm6 = vmmov %vm2440_vm13 }
 0x374   :  { %v1195_v56 = vpack.c.bf16 %v735_v51, %v716_v48  ;;  %1218 = vmatprep.subr.msk.bf16.mxu1 %vm2439_vm14, %v1216_v33  ;;  %v750_v9 = vsel %vm2440_vm13, %v1429_v61, %v1430_v59  ;;  %vm2442_vm2 = vmmov %vm2441_vm6  ;;  %vm2444_vm7 = vnez %v2333_v47  ;;  %vm2446_vm4 = vcmp.lt.s32.totalorder %v1575_v10, 113 }
 0x375   :  { %v748_v1 = vsel %vm2441_vm6, %v1434_v2, %v1435_v8  ;;  %v749_v55 = vsel %vm2442_vm2, %v1430_v59, %v1434_v2  ;;  %vm2443_vm3 = vmmov %vm2442_vm2  ;;  %v1438_v23 = vpop.permute.xlu1 %1437  ;;  %1221 = vmatpush1.bf16.msk.msra.mxu1 %vm2444_vm7, %v1219_v58  ;;  %v1201_v38 = vpack.c.bf16 %v750_v9, %v2065_v31  ;;  %vm2447_vm9 = vnez %v2344_v62 }
 0x376   :  { %1197 = vmatpush1.bf16.msk.msra.mxu0 %vm2391_vm12, %v1195_v56  ;;  %v751_v54 = vsel %vm2443_vm3, %v1435_v8, %v1429_v61  ;;  %v1198_v28 = vpack.c.bf16 %v749_v55, %v2067_v42  ;;  %v1225_v15 = vpack.c.bf16 %v748_v1, %v2069_v18  ;;  %v1443_v21 = vpop.permute.xlu0 %1442  ;;  %v1440_v22 = vunpack.i.h.bf16 %v1438_v23  ;;  %vm2448_vm14 = vmmov %vm2446_vm4 }
 0x377   :  { %v1222_v14 = vpack.c.bf16 %v751_v54, %v2071_v16  ;;  %v1439_v25 = vunpack.i.l.bf16 %v1438_v23  ;;  %v1445_v26 = vunpack.i.h.bf16 %v1443_v21  ;;  %v1444_v27 = vunpack.i.l.bf16 %v1443_v21 }
 0x378   :  { %vm2445_vm12 = vnez %v2336_v50  ;;  %vm2449_vm13 = vnez %v2346_v0  ;;  %vm2451_vm6 = vcmp.lt.s32.totalorder %v1575_v10, 112 }
 0x379   :  { %1200 = vmatprep.subr.msk.bf16.mxu0 %vm2445_vm12, %v1198_v28  ;;  %1224 = vmatprep.subr.msk.bf16.mxu1 %vm2398_vm11, %v1222_v14  ;;  %v765_v47 = vsel %vm2446_vm4, %v1440_v22, %v1444_v27  ;;  %v1448_v31 = vpop.permute.xlu1 %1447  ;;  %v767_v42 = vsel %vm2448_vm14, %v1445_v26, %v1439_v25  ;;  %vm2450_vm11 = vmmov %vm2446_vm4  ;;  %vm2463_vm14 = vcmask 588800  }
 0x37a   :  { %1203 = vmatpush1.bf16.msk.msra.mxu0 %vm2447_vm9, %v1201_v38  ;;  %v1450_v18 = vunpack.i.h.bf16 %v1448_v31  ;;  %v1449_v16 = vunpack.i.l.bf16 %v1448_v31  ;;  %1227 = vmatpush1.bf16.msk.msra.mxu1 %vm2449_vm13, %v1225_v15  ;;  %v1453_v50 = vpop.permute.xlu0 %1452  ;;  %v764_v53 = vsel %vm2450_vm11, %v1444_v27, %v1445_v26  ;;  %v769_v36 = vsel %vm1798_vm10, %v765_v47, 0.0  ;;  %vm2452_vm2 = vmmov %vm2451_vm6 }
 0x37b   :  { %v1455_v32 = vunpack.i.h.bf16 %v1453_v50  ;;  %v1454_v35 = vunpack.i.l.bf16 %v1453_v50  ;;  %v771_v30 = vsel %vm1802_vm15, %v767_v42, 0.0  ;;  %vm2453_vm3 = vmmov %vm2452_vm2  ;;  %vm2464_vm13 = vnez %v2321_v7 }
 0x37c   :  { %v786_v62 = vsel %vm2451_vm6, %v1449_v16, %v1450_v18  ;;  %vm2454_vm7 = vmmov %vm2452_vm2 }
 0x37d   :  { %v784_v6 = vsel %vm2452_vm2, %v1454_v35, %v1455_v32  ;;  %v785_v0 = vsel %vm2453_vm3, %v1450_v18, %v1454_v35  ;;  %v787_v19 = vsel %vm2454_vm7, %v1455_v32, %v1449_v16  ;;  %v793_v20 = vpop.permute.xlu1 %792  ;;  %vm2455_vm12 = vmmov %vm2446_vm4  ;;  %vm2456_vm4 = vcmp.lt.s32.totalorder %v1575_v10, 111 }
 0x37e   :  { %v766_v37 = vsel %vm2455_vm12, %v1439_v25, %v1440_v22  ;;  %v1204_v43 = vpack.c.bf16 %v785_v0, %v769_v36  ;;  %v1228_v29 = vpack.c.bf16 %v787_v19, %v771_v30  ;;  %v1231_v57 = vpack.c.bf16 %v784_v6, %v764_v53  ;;  %v795_v45 = vpop.permute.xlu0 %794  ;;  %vm2457_vm9 = vmmov %vm2456_vm4 }
 0x37f   :  { %v1207_v46 = vpack.c.bf16 %v786_v62, %v766_v37  ;;  %vm2465_vm11 = vmmov %vm2463_vm14 }
 0x380   :  { %1206 = vmatprep.subr.msk.bf16.mxu0 %vm1819_vm8, %v1204_v43  ;;  %1230 = vmatprep.subr.msk.bf16.mxu1 %vm1835_vm1, %v1228_v29  ;;  %vm2458_vm8 = vmmov %vm2456_vm4 }
 0x381   :  { %v797_v44 = vpop.permute.xlu1 %796  ;;  %1209 = vmatpush1.bf16.msk.msra.mxu0 %vm1850_vm5, %v1207_v46  ;;  %1233 = vmatpush1.bf16.msk.msra.mxu1 %vm1857_vm0, %v1231_v57  ;;  %v802_v34 = vsel %vm2458_vm8, %v793_v20, %v795_v45  ;;  %vm2459_vm5 = vnez %v2313_v60  ;;  %vm2460_vm1 = vmmov %vm2456_vm4  ;;  %vm2462_vm0 = vnez %v2317_v3 }
 0x382   :  { %v801_v48 = vsel %vm2456_vm4, %v795_v45, %v797_v44  ;;  %v799_v11 = vpop.permute.xlu0 %798 }
 0x383   :  { %v805_v63 = vsel %vm1798_vm10, %v801_v48, 0.0  ;;  %v803_v24 = vsel %vm2457_vm9, %v799_v11, %v793_v20  ;;  %v800_v4 = vsel %vm2460_vm1, %v797_v44, %v799_v11  ;;  %vm2461_vm10 = vnez %v2319_v5 }
 0x384   :  { %v807_v49 = vsel %vm1802_vm15, %v803_v24, 0.0  ;;  %1068 = vmatprep.subr.msk.mxu0 %vm2459_vm5, %v805_v63 }
 0x385   :  { %1069 = vmatpush1.msk.msra.mxu0 %vm2461_vm10, %v802_v34  ;;  %1083 = vmatprep.subr.msk.mxu1 %vm2462_vm0, %v807_v49 }
 0x386   :  { %1070 = vmatmul.mubr.msk.f32.vlgmr.msra.gmra.mrb[4].mxu0 %vm2463_vm14, %v812_v17  ;;  %1084 = vmatpush1.msk.msra.mxu1 %vm2464_vm13, %v800_v4 }
 0x387   :  { %1085 = vmatmul.mubr.msk.f32.vlgmr.msra.gmra.mrb[4].mxu1 %vm2465_vm11, %v812_v17 }
 0x392   :  { %v817_v12 = vpop.permute.xlu1 %816 }
 0x459   :  { %v888_v41 = vpop.f32.mrb[4].mxu0 }
 0x45a   :  { %v889_v60 = vadd.f32 %v888_v41, %v817_v12  ;;  %v890_v13 = vpop.f32.mrb[5].mxu0  ;;  %v959_v40 = vpop.f32.mrb[4].mxu1 }
 0x45b   :  { %v891_v10 = vadd.f32 %v890_v13, %v817_v12  ;;  %v960_v51 = vadd.f32 %v959_v40, %v817_v12  ;;  %v961_v52 = vpop.f32.mrb[5].mxu1 }
 0x45c   :  { %v1086_v5 = vmul.f32 -1.442695, %v889_v60  ;;  %v962_v56 = vadd.f32 %v961_v52, %v817_v12 }
 0x45d   :  { %v1087_v33 = vmul.f32 -1.442695, %v891_v10  ;;  %v1088_v3 = vmul.f32 -1.442695, %v960_v51 }
 0x45e   :  { %1457 = vpow2.f32 %v1086_v5  ;;  %v1089_v58 = vmul.f32 -1.442695, %v962_v56 }
 0x45f   :  { %1459 = vpow2.f32 %v1087_v33 }
 0x460   :  { %1461 = vpow2.f32 %v1088_v3 }
 0x461   :  { %1463 = vpow2.f32 %v1089_v58 }
 0x468   :  { %v1458_v7 = vpop.eup %1457 }
 0x469   :  { %v1460_v59 = vpop.eup %1459  ;;  %v976_v39 = vadd.f32 1.0, %v1458_v7 }
 0x46a   :  { %v1462_v61 = vpop.eup %1461  ;;  %v977_v8 = vadd.f32 1.0, %v1460_v59 }
 0x46b   :  { %v1464_v2 = vpop.eup %1463  ;;  %1465 = vrcp.f32 %v976_v39  ;;  %v978_v9 = vadd.f32 1.0, %v1462_v61 }
 0x46c   :  { %1467 = vrcp.f32 %v977_v8  ;;  %v979_v1 = vadd.f32 1.0, %v1464_v2 }
 0x46d   :  { %1469 = vrcp.f32 %v978_v9 }
 0x46e   :  { %1471 = vrcp.f32 %v979_v1 }
 0x475   :  { %v1466_v55 = vpop.eup %1465 }
 0x476   :  { %v1468_v54 = vpop.eup %1467  ;;  %988 = vst [vmem:[%s2250_s7] sm:$0xff] %v1466_v55 }
 0x477   :  { %v1470_v23 = vpop.eup %1469  ;;  %989 = vst [vmem:[%s2250_s7 + $0x8] sm:$0xff] %v1468_v54 }
 0x478   :  { %v1472_v38 = vpop.eup %1471  ;;  %990 = vst [vmem:[%s2250_s7 + $0x10] sm:$0xff] %v1470_v23 }
 0x479   :  { %991 = vst [vmem:[%s2250_s7 + $0x18] sm:$0xff] %v1472_v38 }

</bundles_post_ra>
